<compile_context>
chip_gen: v6e
topology: v6e:2x2x1
jax: 0.10.0
libtpu: 0.0.40
codegen_flags: <defaults>
</compile_context>

<pallas_src>
import jax
import jax.numpy as jnp
from jax.experimental import pallas as pl
from jax.experimental.pallas import tpu as pltpu


LANE = 128


def _cdiv(a: int, b: int) -> int:
    return -(-a // b)


def _round_up(x: int, m: int) -> int:
    return ((x + m - 1) // m) * m


def _device_kind() -> str:
    try:
        return jax.devices()[0].device_kind.lower()
    except Exception:
        return ""


def film_kernel(x_ref, gb_ref, o_ref):
    # x_ref / o_ref : (block_rows, block_lanes)
    # gb_ref        : (block_rows, 2) f32, columns = [gamma, beta]
    gb = gb_ref[...]
    gamma = gb[:, 0:1]                      # (block_rows, 1)
    beta = gb[:, 1:2]                       # (block_rows, 1)
    xf = x_ref[...].astype(jnp.float32)     # do the affine in f32
    o_ref[...] = (gamma * xf + beta).astype(o_ref.dtype)


def film_block(x, gamma, beta, *, target_tile_bytes=None, max_block_lanes=2048):
    """FiLM: out[n,c,h,w] = gamma[n,c] * x[n,c,h,w] + beta[n,c]."""
    N, C, H, W = x.shape
    R, L = N * C, H * W
    itemsize = jnp.dtype(x.dtype).itemsize
    sublane = {4: 8, 2: 16, 1: 32}.get(itemsize, 8)

    # ---- per-generation tuning knobs.
    kind = _device_kind()
    if target_tile_bytes is None:
        if "v5" in kind:
            target_tile_bytes = 2 * 1024 * 1024   # ~0.8 TB/s: overhead already small
        elif "v7" in kind:
            target_tile_bytes = 8 * 1024 * 1024   # 3.2 TB/s: amortize per-step cost
        else:
            target_tile_bytes = 6 * 1024 * 1024   # v6e / unknown
    vmem_cap = 48 * 1024 * 1024 if "v7" in kind else 100 * 1024 * 1024

    # ---- lane (spatial) tiling: split L as evenly as possible, 128-aligned.
    if L <= LANE:
        block_lanes = L                      # equal-to-full-dim block is always legal
    else:
        L_aligned = _round_up(L, LANE)
        n_lane_tiles = _cdiv(L_aligned, max_block_lanes)
        block_lanes = _round_up(_cdiv(L_aligned, n_lane_tiles), LANE)

    # ---- row tiling: ~target_tile_bytes per x tile, aligned to sublane packing.
    if R <= sublane:
        block_rows = R                       # equal-to-full-dim block is always legal
    else:
        target_rows = max(
            sublane,
            (target_tile_bytes // (block_lanes * itemsize)) // sublane * sublane)
        block_rows = min(target_rows, _round_up(R, sublane))

    n_row = _cdiv(R, block_rows)
    n_lane = _cdiv(L, block_lanes)

    # ---- v7x megacore: keep both TensorCores busy and balanced when possible.
    if n_row * n_lane < 2 and block_rows > sublane:
        block_rows = max(sublane, _round_up(_cdiv(R, 2), sublane))
        n_row = _cdiv(R, block_rows)
    if n_lane == 1 and n_row > 1 and n_row % 2 == 1 and block_rows > sublane:
        block_rows = max(sublane, _round_up(_cdiv(R, n_row + 1), sublane))
        n_row = _cdiv(R, block_rows)

    grid = (n_row, n_lane)

    # ---- lane-dense operands (pure reshapes, no padding / extra HBM round-trips).
    x2 = x.reshape(R, L)
    gb = jnp.stack([gamma.reshape(R).astype(jnp.float32),
                    beta.reshape(R).astype(jnp.float32)], axis=-1)   # (R, 2) f32

    # ---- scoped VMEM from the actual working set (+25% margin), clamped per-chip.
    x_tile_bytes = block_rows * block_lanes * itemsize
    gb_tile_bytes = block_rows * LANE * 4          # (rows, 2) pads to 128 lanes in VMEM
    working_set = 2 * (2 * x_tile_bytes) + 2 * gb_tile_bytes   # double-buffered x+out+gb
    vmem_limit = int(min(vmem_cap, max(working_set * 5 // 4, 16 * 1024 * 1024)))

    cost = pl.CostEstimate(
        flops=2 * R * L,
        transcendentals=0,
        bytes_accessed=2 * R * L * itemsize + 8 * R,
    )

    out2 = pl.pallas_call(
        film_kernel,
        out_shape=jax.ShapeDtypeStruct((R, L), x.dtype),
        grid_spec=pltpu.PrefetchScalarGridSpec(
            num_scalar_prefetch=0,
            grid=grid,
            in_specs=[
                # x: full 2-D tiling (ragged edges handled by Pallas partial blocks).
                pl.BlockSpec((block_rows, block_lanes), lambda i, j: (i, j)),
                # gamma/beta pack: depends only on the row tile -> fetched once per
                # row tile and resident across every lane step.
                pl.BlockSpec((block_rows, 2), lambda i, j: (i, 0)),
            ],
            out_specs=pl.BlockSpec((block_rows, block_lanes), lambda i, j: (i, j)),
        ),
        compiler_params=pltpu.CompilerParams(
            dimension_semantics=("parallel", "parallel"),
            vmem_limit_bytes=vmem_limit,
        ),
        cost_estimate=cost,
    )(x2, gb)

    return out2.reshape(N, C, H, W)


if __name__ == "__main__":
    key = jax.random.PRNGKey(0)
    kx, kg, kb = jax.random.split(key, 3)

    N, C, H, W = 2, 4, 16, 16
    x = jax.random.normal(kx, (N, C, H, W), dtype=jnp.float32)
    gamma = jax.random.normal(kg, (N, C), dtype=jnp.float32)
    beta = jax.random.normal(kb, (N, C), dtype=jnp.float32)

    out = film_block(x, gamma, beta)
    out = jax.block_until_ready(out)

    # Reference check (same semantics as the PyTorch forward).
    ref = gamma[:, :, None, None] * x + beta[:, :, None, None]
    assert out.shape == (N, C, H, W)
    assert jnp.allclose(out, ref, atol=1e-6, rtol=1e-6)

    print("KERNEL_OK")
</pallas_src>

<mosaic_0001>
module attributes {stable_mosaic.version = 11 : i64} {
  func.func @film_kernel(%arg0: i32, %arg1: i32, %arg2: memref<8x256xf32, #tpu.memory_space<vmem>>, %arg3: memref<8x2xf32, #tpu.memory_space<vmem>>, %arg4: memref<8x256xf32, #tpu.memory_space<vmem>>) attributes {dimension_semantics = [#tpu.dimension_semantics<parallel>, #tpu.dimension_semantics<parallel>], iteration_bounds = array<i64: 1, 1>, scalar_prefetch = 0 : i64, scratch_operands = 0 : i64, tpu.core_type = #tpu.core_type<tc>, window_params = [{transform_indices = @transform_0, window_bounds = array<i64: 8, 256>}, {transform_indices = @transform_1, window_bounds = array<i64: 8, 2>}, {transform_indices = @transform_2, window_bounds = array<i64: 8, 256>}]} {
    %c0 = arith.constant 0 : index
    %c0_0 = arith.constant 0 : index
    %0 = vector.load %arg3[%c0, %c0_0] : memref<8x2xf32, #tpu.memory_space<vmem>>, vector<8x2xf32>
    %1 = vector.extract_strided_slice %0 {offsets = [0, 0], sizes = [8, 1], strides = [1, 1]} : vector<8x2xf32> to vector<8x1xf32>
    %2 = vector.extract_strided_slice %0 {offsets = [0, 1], sizes = [8, 1], strides = [1, 1]} : vector<8x2xf32> to vector<8x1xf32>
    %c0_1 = arith.constant 0 : index
    %c0_2 = arith.constant 0 : index
    %3 = vector.load %arg2[%c0_1, %c0_2] : memref<8x256xf32, #tpu.memory_space<vmem>>, vector<8x256xf32>
    %4 = vector.broadcast %1 : vector<8x1xf32> to vector<8x256xf32>
    %5 = arith.mulf %4, %3 : vector<8x256xf32>
    %6 = vector.broadcast %2 : vector<8x1xf32> to vector<8x256xf32>
    %7 = arith.addf %5, %6 : vector<8x256xf32>
    %c0_3 = arith.constant 0 : index
    %c0_4 = arith.constant 0 : index
    %8 = vector.load %arg4[%c0_3, %c0_4] : memref<8x256xf32, #tpu.memory_space<vmem>>, vector<8x256xf32>
    tpu.vector_store %arg4[%c0_3, %c0_4], %7 {strides = array<i32>} : memref<8x256xf32, #tpu.memory_space<vmem>>, vector<8x256xf32>,
    return
  }
  func.func @transform_0(%arg0: i32, %arg1: i32) -> (i32, i32) {
    %c0_i32 = arith.constant 0 : i32
    return %arg0, %arg1 : i32, i32
  }
  func.func @transform_1(%arg0: i32, %arg1: i32) -> (i32, i32) {
    %c0_i32 = arith.constant 0 : i32
    %c0_i32_0 = arith.constant 0 : i32
    return %arg0, %c0_i32 : i32, i32
  }
  func.func @transform_2(%arg0: i32, %arg1: i32) -> (i32, i32) {
    %c0_i32 = arith.constant 0 : i32
    return %arg0, %arg1 : i32, i32
  }
}

</mosaic_0001>

<bundles_post_ra>
// kernel: tpu_custom_call.1
= control target key start
LH: loop header
LB: loop body
LE: loop exit
PB: predicated region body
PF: predicated region fallthrough
CT: control target
= control target key end

     0   :  { %7 = vsyncpa [#allocation3], 0  ;;  %s135_s0 = inlined_call_operand.hbm [shape: f32[8,256], index: 0, kind: input, shape index: {}]   ;;  %s136_s1 = inlined_call_operand.vmem [shape: f32[8,2], index: 1, kind: input, shape index: {}]   ;;  %s137_s2 = inlined_call_operand.hbm [shape: f32[8,256], index: 2, kind: output, shape index: {}]  }
   0x1   :  { %8 = vsyncpa [#allocation4], 0  ;;  %s107_s9 = smov [#allocation2]  }
   0x2   :  { %s15_s10 = sshll.u32 %s107_s9, 4  ;;  %s16_s10 = int_to_ptr.vmem [resolvable:$true] %s15_s10 }
   0x3   :  { %s71_s11 = scalar_lea.vmem %s16_s10, 256  ;;  %p76_p1 = scmp.lt.s32.totalorder %s16_s10, %s16_s10 }
   0x4   :  { %p72_p0 = scmp.ne.s32.totalorder %s16_s10, %s71_s11  ;;  %p77_p2 = scmp.lt.s32.totalorder %s71_s11, %s71_s11 }
   0x6   :  { %p78_p3 = por %p77_p2, %p76_p1 }
   0x8   :  { %p79_p4 = pnand %p78_p3, %p72_p0 }
   0xa   :  { %82 = shalt.err (!%p79_p4)
}
   0xb   :  { %18 = dma.hbm_to_vmem [thread:$0]  %s135_s0, 256, %s16_s10, [#allocation3]  }
   0xc   :  { %103 = dma.done.wait [#allocation3], 256  }
   0xd   :  { %104 = vsyncadd [#allocation3], 4294967040  ;;  %v108_v0 = vmov 0   ;;  %v24_v1 = vld [vmem:[%s136_s1] sm:$0xff]  ;;  %v109_v2 = vmov 1   ;;  %v26_v5 = vld [vmem:[#allocation2 + $0x8] sm:$0xff] }
   0xe   :  { %61 = vset.pattern.permute.xlu0 %v108_v0  ;;  %v25_v4 = vld [vmem:[#allocation2] sm:$0xff]  ;;  %s110_s16 = smov [#allocation5]  }
   0xf   :  { %29 = vperm.xlu0 %61, %v24_v1   ;;  %s48_s17 = sshll.u32 %s110_s16, 4  ;;  %s49_s17 = int_to_ptr.vmem [resolvable:$true] %s48_s17 }
  0x10   :  { %s83_s0 = scalar_lea.vmem %s49_s17, 256  ;;  %p88_p6 = scmp.lt.s32.totalorder %s49_s17, %s49_s17 }
  0x11   :  { %p84_p5 = scmp.ne.s32.totalorder %s49_s17, %s83_s0  ;;  %p89_p7 = scmp.lt.s32.totalorder %s83_s0, %s83_s0 }
  0x13   :  { %62 = vset.pattern.permute.xlu0 %v109_v2  ;;  %p90_p8 = por %p89_p7, %p88_p6 }
  0x14   :  { %35 = vperm.xlu0 %62, %v24_v1  }
  0x15   :  { %p91_p9 = pnand %p90_p8, %p84_p5 }
  0x8a   :  { %v30_v3 = vpop.permute.xlu0 %29 }
  0x8b   :  { %v32_v6 = vmul.f32 %v30_v3, %v25_v4  ;;  %v33_v7 = vmul.f32 %v30_v3, %v26_v5 }
  0x8f   :  { %v36_v8 = vpop.permute.xlu0 %35 }
  0x90   :  { %v38_v9 = vadd.f32 %v36_v8, %v32_v6  ;;  %v39_v10 = vadd.f32 %v36_v8, %v33_v7 }
  0x92   :  { %40 = vst [vmem:[#allocation5] sm:$0xff] %v38_v9  ;;  %41 = vst [vmem:[#allocation5 + $0x8] sm:$0xff] %v39_v10 }
  0x93   :  { %94 = shalt.err (!%p91_p9)
}
  0x94   :  { %51 = dma.vmem_to_hbm [thread:$0]  %s49_s17, 256, %s137_s2, [#allocation4]  }
  0x95   :  { %105 = dma.done.wait [#allocation4], 256  }
  0x96   :  { %106 = vsyncadd [#allocation4], 4294967040 }
  0x97   :  { %55 = vsyncpa [#allocation3], 1 }
  0x98   :  { %56 = vsyncpa [#allocation4], 1 }

</bundles_post_ra>
